<compile_context>
chip_gen: v6e
topology: v6e:2x2x1
jax: 0.10.0
libtpu: 0.0.40
codegen_flags: <defaults>
</compile_context>

<pallas_src>
import functools

import numpy as np

import jax
import jax.numpy as jnp
from jax.experimental import pallas as pl
from jax.experimental.pallas import tpu as pltpu

NUM_BREAKPOINTS = 10
INIT_RANGE = (-3.0, 3.0)

LANE_WIDTH = 512   # preferred lane-dense last dim (multiple of 128)
TILE_ROWS = 1024   # (1024, 512) f32 tile = 2 MiB/buffer; 8 MiB double-buffered
                   # (in + out) -> fits v5e's 16 MiB default scoped VMEM and
                   # leaves ample headroom on v6e/v7x (32 MiB default).


def _round_up(x, m):
    return ((x + m - 1) // m) * m


# ---------------------------------------------------------------------------
# Kernels
# ---------------------------------------------------------------------------
def _uniform_spline_kernel(knots_ref, hp_ref, c0_ref, c1_ref, c2_ref, c3_ref,
                           x_ref, o_ref, *, compute_dtype):
    """Uniform-knot fast path.

    knots_ref: SMEM (P,) f32 (only ends used, for the clamp).
    hp_ref:    SMEM (2,) f32 = [h_step, 1/h_step] (scalar uniform spacing).
    c0..c3:    SMEM (P-1,) f32 per-segment Horner coefficients in local t.
    x_ref/o_ref: VMEM blocks in the activation dtype.
    """
    P = knots_ref.shape[0]
    k0 = knots_ref[0]
    h_step = hp_ref[0]
    inv_h = hp_ref[1]

    x = x_ref[...].astype(jnp.float32)
    xc = jnp.clip(x, k0, knots_ref[P - 1])          # torch.clamp equivalent

    # Segment index from the uniform grid (no searchsorted / select chain).
    u = (xc - k0) * inv_h
    segf = jnp.clip(jnp.floor(u), 0.0, jnp.float32(P - 2))
    # Reconstruct the left knot instead of selecting it: cheap and keeps t
    # numerically close to the reference's (x - knots[seg]) / h.
    x0 = k0 + segf * h_step
    t = ((xc - x0) * inv_h).astype(compute_dtype)

    # Coefficient select chains (4 chains, one shared compare per knot).
    c0 = c0_ref[0].astype(compute_dtype)
    c1 = c1_ref[0].astype(compute_dtype)
    c2 = c2_ref[0].astype(compute_dtype)
    c3 = c3_ref[0].astype(compute_dtype)
    for j in range(1, P - 1):
        m = segf >= jnp.float32(j)                  # one compare, reused 4x
        c0 = jnp.where(m, c0_ref[j].astype(compute_dtype), c0)
        c1 = jnp.where(m, c1_ref[j].astype(compute_dtype), c1)
        c2 = jnp.where(m, c2_ref[j].astype(compute_dtype), c2)
        c3 = jnp.where(m, c3_ref[j].astype(compute_dtype), c3)

    y = ((c3 * t + c2) * t + c1) * t + c0
    o_ref[...] = y.astype(o_ref.dtype)


def _general_spline_kernel(knots_ref, inv_h_ref, c0_ref, c1_ref, c2_ref, c3_ref,
                           x_ref, o_ref):
    """General (non-uniform knots) fallback: 6 select chains over the knots."""
    P = knots_ref.shape[0]
    x = x_ref[...].astype(jnp.float32)
    xc = jnp.clip(x, knots_ref[0], knots_ref[P - 1])

    x0 = knots_ref[0]
    ih = inv_h_ref[0]
    c0 = c0_ref[0]
    c1 = c1_ref[0]
    c2 = c2_ref[0]
    c3 = c3_ref[0]
    for j in range(1, P - 1):
        m = xc > knots_ref[j]                       # == searchsorted('left')-1
        x0 = jnp.where(m, knots_ref[j], x0)
        ih = jnp.where(m, inv_h_ref[j], ih)
        c0 = jnp.where(m, c0_ref[j], c0)
        c1 = jnp.where(m, c1_ref[j], c1)
        c2 = jnp.where(m, c2_ref[j], c2)
        c3 = jnp.where(m, c3_ref[j], c3)

    t = (xc - x0) * ih
    y = ((c3 * t + c2) * t + c1) * t + c0
    o_ref[...] = y.astype(o_ref.dtype)


# ---------------------------------------------------------------------------
# Host-side helpers
# ---------------------------------------------------------------------------
def _host_coeffs(knots, values, derivatives):
    """Per-segment Horner coefficients c0..c3 in local t (Hermite expansion)."""
    knots_f = knots.astype(jnp.float32)
    values_f = values.astype(jnp.float32)
    derivs_f = derivatives.astype(jnp.float32)
    h = knots_f[1:] - knots_f[:-1]                  # (P-1,)
    inv_h = 1.0 / h
    y0, y1 = values_f[:-1], values_f[1:]
    hd0, hd1 = h * derivs_f[:-1], h * derivs_f[1:]
    c0 = y0
    c1 = hd0
    c2 = -3.0 * y0 + 3.0 * y1 - 2.0 * hd0 - hd1
    c3 = 2.0 * y0 - 2.0 * y1 + hd0 + hd1
    return knots_f, inv_h, c0, c1, c2, c3


def _knots_are_uniform(knots):
    """Concrete-value uniformity check (False if tracing or non-uniform)."""
    try:
        k = np.asarray(jax.device_get(knots), dtype=np.float64)
    except Exception:
        return False          # traced under jit -> use the general kernel
    if k.ndim != 1 or k.size < 2:
        return False
    h = np.diff(k)
    if np.any(h <= 0):
        return False
    return bool(np.max(np.abs(h - h[0])) <= 1e-6 * abs(h[0]))


def _bf16_valu_ok():
    """bf16 VALU available? (v6e/v7x yes; v2-v5 no)."""
    try:
        kind = jax.devices()[0].device_kind.lower()
    except Exception:
        return False
    return not any(tag in kind for tag in ("v2", "v3", "v4", "v5"))


# ---------------------------------------------------------------------------
# Public wrapper
# ---------------------------------------------------------------------------
def cubic_spline(x, knots, values, derivatives, *,
                 tile_rows=TILE_ROWS, lane_width=LANE_WIDTH):
    """Apply the learnable cubic spline activation elementwise to x."""
    orig_shape = x.shape
    orig_dtype = x.dtype
    n = int(np.prod(orig_shape)) if orig_shape else 1
    if n == 0:
        return x

    knots_f, inv_h_vec, c0, c1, c2, c3 = _host_coeffs(knots, values, derivatives)
    P = knots_f.shape[0]

    # ---- lane-dense 2-D slab without a full-tensor pad when possible ----
    lw = None
    for cand in (lane_width, 256, 128):
        if n % cand == 0:
            lw = cand
            break
    pad = 0
    if lw is None:
        # TODO(synk): rare fallback (n not a multiple of 128) still pays one
        # pad copy + one slice copy; a scalar-prefetched tail mask would avoid it.
        lw = lane_width
        pad = _round_up(n, lw) - n
        flat = jnp.pad(x.reshape(-1), (0, pad))
        x2d = flat.reshape(-1, lw)
    else:
        x2d = x.reshape(-1, lw)
    rows = x2d.shape[0]

    # ---- tile rows: multiple of 8 (or full extent); aim for >= 2 grid steps
    # so ("parallel",) can use both TensorCores on v7x ----
    if rows <= 8:
        tr = rows
    else:
        tr = min(tile_rows, _round_up(pl.cdiv(rows, 2), 8))
    grid = (pl.cdiv(rows, tr),)

    # ---- kernel / operand selection ----
    if _knots_are_uniform(knots):
        compute_dtype = (jnp.bfloat16
                         if orig_dtype == jnp.bfloat16 and _bf16_valu_ok()
                         else jnp.float32)
        span = knots_f[P - 1] - knots_f[0]
        h_step = span / jnp.float32(P - 1)
        hparams = jnp.stack([h_step, jnp.float32(1.0) / h_step])
        kernel = functools.partial(_uniform_spline_kernel,
                                   compute_dtype=compute_dtype)
        scalar_args = (knots_f, hparams, c0, c1, c2, c3)
        flops_per_elem = 58
    else:
        kernel = _general_spline_kernel
        scalar_args = (knots_f, inv_h_vec, c0, c1, c2, c3)
        flops_per_elem = 70

    itemsize = jnp.dtype(orig_dtype).itemsize
    cost = pl.CostEstimate(flops=flops_per_elem * rows * lw,
                           transcendentals=0,
                           bytes_accessed=2 * rows * lw * itemsize)

    out2d = pl.pallas_call(
        kernel,
        out_shape=jax.ShapeDtypeStruct((rows, lw), orig_dtype),
        grid=grid,
        in_specs=[pl.BlockSpec(memory_space=pltpu.MemorySpace.SMEM)] * len(scalar_args)
                 + [pl.BlockSpec((tr, lw), lambda i: (i, 0))],
        out_specs=pl.BlockSpec((tr, lw), lambda i: (i, 0)),
        compiler_params=pltpu.CompilerParams(dimension_semantics=("parallel",)),
        cost_estimate=cost,
    )(*scalar_args, x2d)

    if pad:
        return out2d.reshape(-1)[:n].reshape(orig_shape)
    return out2d.reshape(orig_shape)


# ---------------------------------------------------------------------------
# Pure-JAX reference (mirrors the PyTorch forward) and self-test
# ---------------------------------------------------------------------------
def _reference(x, knots, values, derivatives):
    P = knots.shape[0]
    xc = jnp.clip(x, knots[0], knots[-1])
    seg = jnp.searchsorted(knots, xc, side="left") - 1
    seg = jnp.clip(seg, 0, P - 2)
    x0, x1 = knots[seg], knots[seg + 1]
    y0, y1 = values[seg], values[seg + 1]
    d0, d1 = derivatives[seg], derivatives[seg + 1]
    h = x1 - x0
    t = (xc - x0) / h
    t2 = t * t
    t3 = t2 * t
    h00 = 2 * t3 - 3 * t2 + 1
    h10 = t3 - 2 * t2 + t
    h01 = -2 * t3 + 3 * t2
    h11 = t3 - t2
    return h00 * y0 + h10 * (h * d0) + h01 * y1 + h11 * (h * d1)


if __name__ == "__main__":
    key = jax.random.PRNGKey(0)
    kx, kv, kd = jax.random.split(key, 3)

    # Input (NCHW, as the PyTorch module would receive).
    x = jax.random.normal(kx, (2, 4, 16, 16), dtype=jnp.float32) * 2.0

    # Parameters per CubicSpline.__init__ (knots = linspace(-3, 3, 10)).
    # __init__ zero-inits values/derivatives; use deterministic non-zero values
    # here so the spline math is actually exercised.
    knots = jnp.linspace(INIT_RANGE[0], INIT_RANGE[1], NUM_BREAKPOINTS,
                         dtype=jnp.float32)
    values = 0.5 * jax.random.normal(kv, (NUM_BREAKPOINTS,), dtype=jnp.float32)
    derivatives = 0.5 * jax.random.normal(kd, (NUM_BREAKPOINTS,), dtype=jnp.float32)

    # 1) Uniform-knot fast path (the module's init configuration).
    y = jax.block_until_ready(cubic_spline(x, knots, values, derivatives))
    y_ref = _reference(x, knots, values, derivatives)
    assert y.shape == x.shape and y.dtype == x.dtype
    # The fast path evaluates t from the scalar uniform spacing instead of the
    # reference's per-segment divide; the few-ulp difference in t is amplified
    # by |dy/dt| (O(10) here), so allow ~3e-5 absolute (still catches any
    # segment-selection or coefficient bug by orders of magnitude).
    assert jnp.allclose(y, y_ref, atol=3e-5, rtol=1e-5), "uniform path mismatch"

    # 2) General path (trained / non-uniform knots) at the tight tolerance.
    knots_nu = knots + jnp.array(
        [0.0, 0.05, -0.03, 0.02, 0.0, -0.04, 0.06, 0.01, -0.02, 0.0],
        dtype=jnp.float32)
    y2 = jax.block_until_ready(cubic_spline(x, knots_nu, values, derivatives))
    y2_ref = _reference(x, knots_nu, values, derivatives)
    assert jnp.allclose(y2, y2_ref, atol=1e-5, rtol=1e-5), "general path mismatch"

    print("KERNEL_OK")
</pallas_src>

<mosaic_0001>
module attributes {stable_mosaic.version = 11 : i64} {
  func.func @_uniform_spline_kernel(%arg0: i32, %arg1: memref<10xf32, #tpu.memory_space<smem>>, %arg2: memref<2xf32, #tpu.memory_space<smem>>, %arg3: memref<9xf32, #tpu.memory_space<smem>>, %arg4: memref<9xf32, #tpu.memory_space<smem>>, %arg5: memref<9xf32, #tpu.memory_space<smem>>, %arg6: memref<9xf32, #tpu.memory_space<smem>>, %arg7: memref<4x512xf32, #tpu.memory_space<vmem>>, %arg8: memref<4x512xf32, #tpu.memory_space<vmem>>) attributes {dimension_semantics = [#tpu.dimension_semantics<parallel>], iteration_bounds = array<i64: 1>, scalar_prefetch = 0 : i64, scratch_operands = 0 : i64, tpu.core_type = #tpu.core_type<tc>, window_params = [{transform_indices = @transform_0, window_bounds = array<i64: 10>}, {transform_indices = @transform_1, window_bounds = array<i64: 2>}, {transform_indices = @transform_2, window_bounds = array<i64: 9>}, {transform_indices = @transform_3, window_bounds = array<i64: 9>}, {transform_indices = @transform_4, window_bounds = array<i64: 9>}, {transform_indices = @transform_5, window_bounds = array<i64: 9>}, {transform_indices = @transform_6, window_bounds = array<i64: 4, 512>}, {transform_indices = @transform_7, window_bounds = array<i64: 4, 512>}]} {
    %c0 = arith.constant 0 : index
    %0 = memref.load %arg1[%c0] : memref<10xf32, #tpu.memory_space<smem>>
    %c0_0 = arith.constant 0 : index
    %1 = memref.load %arg2[%c0_0] : memref<2xf32, #tpu.memory_space<smem>>
    %c1 = arith.constant 1 : index
    %2 = memref.load %arg2[%c1] : memref<2xf32, #tpu.memory_space<smem>>
    %c0_1 = arith.constant 0 : index
    %c0_2 = arith.constant 0 : index
    %3 = vector.load %arg7[%c0_1, %c0_2] : memref<4x512xf32, #tpu.memory_space<vmem>>, vector<4x512xf32>
    %c9 = arith.constant 9 : index
    %4 = memref.load %arg1[%c9] : memref<10xf32, #tpu.memory_space<smem>>
    %5 = vector.broadcast %0 : f32 to vector<4x512xf32>
    %6 = arith.maximumf %5, %3 : vector<4x512xf32>
    %7 = vector.broadcast %4 : f32 to vector<4x512xf32>
    %8 = arith.minimumf %7, %6 : vector<4x512xf32>
    %9 = vector.broadcast %0 : f32 to vector<4x512xf32>
    %10 = arith.subf %8, %9 : vector<4x512xf32>
    %11 = vector.broadcast %2 : f32 to vector<4x512xf32>
    %12 = arith.mulf %10, %11 : vector<4x512xf32>
    %13 = math.floor %12 : vector<4x512xf32>
    %cst = arith.constant 0.000000e+00 : f32
    %cst_3 = arith.constant 8.000000e+00 : f32
    %14 = vector.broadcast %cst : f32 to vector<4x512xf32>
    %15 = arith.maximumf %14, %13 : vector<4x512xf32>
    %16 = vector.broadcast %cst_3 : f32 to vector<4x512xf32>
    %17 = arith.minimumf %16, %15 : vector<4x512xf32>
    %18 = vector.broadcast %1 : f32 to vector<4x512xf32>
    %19 = arith.mulf %17, %18 : vector<4x512xf32>
    %20 = vector.broadcast %0 : f32 to vector<4x512xf32>
    %21 = arith.addf %20, %19 : vector<4x512xf32>
    %22 = arith.subf %8, %21 : vector<4x512xf32>
    %23 = vector.broadcast %2 : f32 to vector<4x512xf32>
    %24 = arith.mulf %22, %23 : vector<4x512xf32>
    %c0_4 = arith.constant 0 : index
    %25 = memref.load %arg3[%c0_4] : memref<9xf32, #tpu.memory_space<smem>>
    %c0_5 = arith.constant 0 : index
    %26 = memref.load %arg4[%c0_5] : memref<9xf32, #tpu.memory_space<smem>>
    %c0_6 = arith.constant 0 : index
    %27 = memref.load %arg5[%c0_6] : memref<9xf32, #tpu.memory_space<smem>>
    %c0_7 = arith.constant 0 : index
    %28 = memref.load %arg6[%c0_7] : memref<9xf32, #tpu.memory_space<smem>>
    %cst_8 = arith.constant 1.000000e+00 : f32
    %29 = vector.broadcast %cst_8 : f32 to vector<4x512xf32>
    %30 = arith.cmpf oge, %17, %29 : vector<4x512xf32>
    %c1_9 = arith.constant 1 : index
    %31 = memref.load %arg3[%c1_9] : memref<9xf32, #tpu.memory_space<smem>>
    %32 = vector.broadcast %31 : f32 to vector<4x512xf32>
    %33 = vector.broadcast %25 : f32 to vector<4x512xf32>
    %34 = arith.select %30, %32, %33 : vector<4x512xi1>, vector<4x512xf32>
    %c1_10 = arith.constant 1 : index
    %35 = memref.load %arg4[%c1_10] : memref<9xf32, #tpu.memory_space<smem>>
    %36 = vector.broadcast %35 : f32 to vector<4x512xf32>
    %37 = vector.broadcast %26 : f32 to vector<4x512xf32>
    %38 = arith.select %30, %36, %37 : vector<4x512xi1>, vector<4x512xf32>
    %c1_11 = arith.constant 1 : index
    %39 = memref.load %arg5[%c1_11] : memref<9xf32, #tpu.memory_space<smem>>
    %40 = vector.broadcast %39 : f32 to vector<4x512xf32>
    %41 = vector.broadcast %27 : f32 to vector<4x512xf32>
    %42 = arith.select %30, %40, %41 : vector<4x512xi1>, vector<4x512xf32>
    %c1_12 = arith.constant 1 : index
    %43 = memref.load %arg6[%c1_12] : memref<9xf32, #tpu.memory_space<smem>>
    %44 = vector.broadcast %43 : f32 to vector<4x512xf32>
    %45 = vector.broadcast %28 : f32 to vector<4x512xf32>
    %46 = arith.select %30, %44, %45 : vector<4x512xi1>, vector<4x512xf32>
    %cst_13 = arith.constant 2.000000e+00 : f32
    %47 = vector.broadcast %cst_13 : f32 to vector<4x512xf32>
    %48 = arith.cmpf oge, %17, %47 : vector<4x512xf32>
    %c2 = arith.constant 2 : index
    %49 = memref.load %arg3[%c2] : memref<9xf32, #tpu.memory_space<smem>>
    %50 = vector.broadcast %49 : f32 to vector<4x512xf32>
    %51 = arith.select %48, %50, %34 : vector<4x512xi1>, vector<4x512xf32>
    %c2_14 = arith.constant 2 : index
    %52 = memref.load %arg4[%c2_14] : memref<9xf32, #tpu.memory_space<smem>>
    %53 = vector.broadcast %52 : f32 to vector<4x512xf32>
    %54 = arith.select %48, %53, %38 : vector<4x512xi1>, vector<4x512xf32>
    %c2_15 = arith.constant 2 : index
    %55 = memref.load %arg5[%c2_15] : memref<9xf32, #tpu.memory_space<smem>>
    %56 = vector.broadcast %55 : f32 to vector<4x512xf32>
    %57 = arith.select %48, %56, %42 : vector<4x512xi1>, vector<4x512xf32>
    %c2_16 = arith.constant 2 : index
    %58 = memref.load %arg6[%c2_16] : memref<9xf32, #tpu.memory_space<smem>>
    %59 = vector.broadcast %58 : f32 to vector<4x512xf32>
    %60 = arith.select %48, %59, %46 : vector<4x512xi1>, vector<4x512xf32>
    %cst_17 = arith.constant 3.000000e+00 : f32
    %61 = vector.broadcast %cst_17 : f32 to vector<4x512xf32>
    %62 = arith.cmpf oge, %17, %61 : vector<4x512xf32>
    %c3 = arith.constant 3 : index
    %63 = memref.load %arg3[%c3] : memref<9xf32, #tpu.memory_space<smem>>
    %64 = vector.broadcast %63 : f32 to vector<4x512xf32>
    %65 = arith.select %62, %64, %51 : vector<4x512xi1>, vector<4x512xf32>
    %c3_18 = arith.constant 3 : index
    %66 = memref.load %arg4[%c3_18] : memref<9xf32, #tpu.memory_space<smem>>
    %67 = vector.broadcast %66 : f32 to vector<4x512xf32>
    %68 = arith.select %62, %67, %54 : vector<4x512xi1>, vector<4x512xf32>
    %c3_19 = arith.constant 3 : index
    %69 = memref.load %arg5[%c3_19] : memref<9xf32, #tpu.memory_space<smem>>
    %70 = vector.broadcast %69 : f32 to vector<4x512xf32>
    %71 = arith.select %62, %70, %57 : vector<4x512xi1>, vector<4x512xf32>
    %c3_20 = arith.constant 3 : index
    %72 = memref.load %arg6[%c3_20] : memref<9xf32, #tpu.memory_space<smem>>
    %73 = vector.broadcast %72 : f32 to vector<4x512xf32>
    %74 = arith.select %62, %73, %60 : vector<4x512xi1>, vector<4x512xf32>
    %cst_21 = arith.constant 4.000000e+00 : f32
    %75 = vector.broadcast %cst_21 : f32 to vector<4x512xf32>
    %76 = arith.cmpf oge, %17, %75 : vector<4x512xf32>
    %c4 = arith.constant 4 : index
    %77 = memref.load %arg3[%c4] : memref<9xf32, #tpu.memory_space<smem>>
    %78 = vector.broadcast %77 : f32 to vector<4x512xf32>
    %79 = arith.select %76, %78, %65 : vector<4x512xi1>, vector<4x512xf32>
    %c4_22 = arith.constant 4 : index
    %80 = memref.load %arg4[%c4_22] : memref<9xf32, #tpu.memory_space<smem>>
    %81 = vector.broadcast %80 : f32 to vector<4x512xf32>
    %82 = arith.select %76, %81, %68 : vector<4x512xi1>, vector<4x512xf32>
    %c4_23 = arith.constant 4 : index
    %83 = memref.load %arg5[%c4_23] : memref<9xf32, #tpu.memory_space<smem>>
    %84 = vector.broadcast %83 : f32 to vector<4x512xf32>
    %85 = arith.select %76, %84, %71 : vector<4x512xi1>, vector<4x512xf32>
    %c4_24 = arith.constant 4 : index
    %86 = memref.load %arg6[%c4_24] : memref<9xf32, #tpu.memory_space<smem>>
    %87 = vector.broadcast %86 : f32 to vector<4x512xf32>
    %88 = arith.select %76, %87, %74 : vector<4x512xi1>, vector<4x512xf32>
    %cst_25 = arith.constant 5.000000e+00 : f32
    %89 = vector.broadcast %cst_25 : f32 to vector<4x512xf32>
    %90 = arith.cmpf oge, %17, %89 : vector<4x512xf32>
    %c5 = arith.constant 5 : index
    %91 = memref.load %arg3[%c5] : memref<9xf32, #tpu.memory_space<smem>>
    %92 = vector.broadcast %91 : f32 to vector<4x512xf32>
    %93 = arith.select %90, %92, %79 : vector<4x512xi1>, vector<4x512xf32>
    %c5_26 = arith.constant 5 : index
    %94 = memref.load %arg4[%c5_26] : memref<9xf32, #tpu.memory_space<smem>>
    %95 = vector.broadcast %94 : f32 to vector<4x512xf32>
    %96 = arith.select %90, %95, %82 : vector<4x512xi1>, vector<4x512xf32>
    %c5_27 = arith.constant 5 : index
    %97 = memref.load %arg5[%c5_27] : memref<9xf32, #tpu.memory_space<smem>>
    %98 = vector.broadcast %97 : f32 to vector<4x512xf32>
    %99 = arith.select %90, %98, %85 : vector<4x512xi1>, vector<4x512xf32>
    %c5_28 = arith.constant 5 : index
    %100 = memref.load %arg6[%c5_28] : memref<9xf32, #tpu.memory_space<smem>>
    %101 = vector.broadcast %100 : f32 to vector<4x512xf32>
    %102 = arith.select %90, %101, %88 : vector<4x512xi1>, vector<4x512xf32>
    %cst_29 = arith.constant 6.000000e+00 : f32
    %103 = vector.broadcast %cst_29 : f32 to vector<4x512xf32>
    %104 = arith.cmpf oge, %17, %103 : vector<4x512xf32>
    %c6 = arith.constant 6 : index
    %105 = memref.load %arg3[%c6] : memref<9xf32, #tpu.memory_space<smem>>
    %106 = vector.broadcast %105 : f32 to vector<4x512xf32>
    %107 = arith.select %104, %106, %93 : vector<4x512xi1>, vector<4x512xf32>
    %c6_30 = arith.constant 6 : index
    %108 = memref.load %arg4[%c6_30] : memref<9xf32, #tpu.memory_space<smem>>
    %109 = vector.broadcast %108 : f32 to vector<4x512xf32>
    %110 = arith.select %104, %109, %96 : vector<4x512xi1>, vector<4x512xf32>
    %c6_31 = arith.constant 6 : index
    %111 = memref.load %arg5[%c6_31] : memref<9xf32, #tpu.memory_space<smem>>
    %112 = vector.broadcast %111 : f32 to vector<4x512xf32>
    %113 = arith.select %104, %112, %99 : vector<4x512xi1>, vector<4x512xf32>
    %c6_32 = arith.constant 6 : index
    %114 = memref.load %arg6[%c6_32] : memref<9xf32, #tpu.memory_space<smem>>
    %115 = vector.broadcast %114 : f32 to vector<4x512xf32>
    %116 = arith.select %104, %115, %102 : vector<4x512xi1>, vector<4x512xf32>
    %cst_33 = arith.constant 7.000000e+00 : f32
    %117 = vector.broadcast %cst_33 : f32 to vector<4x512xf32>
    %118 = arith.cmpf oge, %17, %117 : vector<4x512xf32>
    %c7 = arith.constant 7 : index
    %119 = memref.load %arg3[%c7] : memref<9xf32, #tpu.memory_space<smem>>
    %120 = vector.broadcast %119 : f32 to vector<4x512xf32>
    %121 = arith.select %118, %120, %107 : vector<4x512xi1>, vector<4x512xf32>
    %c7_34 = arith.constant 7 : index
    %122 = memref.load %arg4[%c7_34] : memref<9xf32, #tpu.memory_space<smem>>
    %123 = vector.broadcast %122 : f32 to vector<4x512xf32>
    %124 = arith.select %118, %123, %110 : vector<4x512xi1>, vector<4x512xf32>
    %c7_35 = arith.constant 7 : index
    %125 = memref.load %arg5[%c7_35] : memref<9xf32, #tpu.memory_space<smem>>
    %126 = vector.broadcast %125 : f32 to vector<4x512xf32>
    %127 = arith.select %118, %126, %113 : vector<4x512xi1>, vector<4x512xf32>
    %c7_36 = arith.constant 7 : index
    %128 = memref.load %arg6[%c7_36] : memref<9xf32, #tpu.memory_space<smem>>
    %129 = vector.broadcast %128 : f32 to vector<4x512xf32>
    %130 = arith.select %118, %129, %116 : vector<4x512xi1>, vector<4x512xf32>
    %cst_37 = arith.constant 8.000000e+00 : f32
    %131 = vector.broadcast %cst_37 : f32 to vector<4x512xf32>
    %132 = arith.cmpf oge, %17, %131 : vector<4x512xf32>
    %c8 = arith.constant 8 : index
    %133 = memref.load %arg3[%c8] : memref<9xf32, #tpu.memory_space<smem>>
    %134 = vector.broadcast %133 : f32 to vector<4x512xf32>
    %135 = arith.select %132, %134, %121 : vector<4x512xi1>, vector<4x512xf32>
    %c8_38 = arith.constant 8 : index
    %136 = memref.load %arg4[%c8_38] : memref<9xf32, #tpu.memory_space<smem>>
    %137 = vector.broadcast %136 : f32 to vector<4x512xf32>
    %138 = arith.select %132, %137, %124 : vector<4x512xi1>, vector<4x512xf32>
    %c8_39 = arith.constant 8 : index
    %139 = memref.load %arg5[%c8_39] : memref<9xf32, #tpu.memory_space<smem>>
    %140 = vector.broadcast %139 : f32 to vector<4x512xf32>
    %141 = arith.select %132, %140, %127 : vector<4x512xi1>, vector<4x512xf32>
    %c8_40 = arith.constant 8 : index
    %142 = memref.load %arg6[%c8_40] : memref<9xf32, #tpu.memory_space<smem>>
    %143 = vector.broadcast %142 : f32 to vector<4x512xf32>
    %144 = arith.select %132, %143, %130 : vector<4x512xi1>, vector<4x512xf32>
    %145 = arith.mulf %144, %24 : vector<4x512xf32>
    %146 = arith.addf %145, %141 : vector<4x512xf32>
    %147 = arith.mulf %146, %24 : vector<4x512xf32>
    %148 = arith.addf %147, %138 : vector<4x512xf32>
    %149 = arith.mulf %148, %24 : vector<4x512xf32>
    %150 = arith.addf %149, %135 : vector<4x512xf32>
    %c0_41 = arith.constant 0 : index
    %c0_42 = arith.constant 0 : index
    %151 = vector.load %arg8[%c0_41, %c0_42] : memref<4x512xf32, #tpu.memory_space<vmem>>, vector<4x512xf32>
    tpu.vector_store %arg8[%c0_41, %c0_42], %150 {strides = array<i32>} : memref<4x512xf32, #tpu.memory_space<vmem>>, vector<4x512xf32>,
    return
  }
  func.func @transform_0(%arg0: i32) -> i32 {
    %c0_i32 = arith.constant 0 : i32
    %c0_i32_0 = arith.constant 0 : i32
    return %c0_i32 : i32
  }
  func.func @transform_1(%arg0: i32) -> i32 {
    %c0_i32 = arith.constant 0 : i32
    %c0_i32_0 = arith.constant 0 : i32
    return %c0_i32 : i32
  }
  func.func @transform_2(%arg0: i32) -> i32 {
    %c0_i32 = arith.constant 0 : i32
    %c0_i32_0 = arith.constant 0 : i32
    return %c0_i32 : i32
  }
  func.func @transform_3(%arg0: i32) -> i32 {
    %c0_i32 = arith.constant 0 : i32
    %c0_i32_0 = arith.constant 0 : i32
    return %c0_i32 : i32
  }
  func.func @transform_4(%arg0: i32) -> i32 {
    %c0_i32 = arith.constant 0 : i32
    %c0_i32_0 = arith.constant 0 : i32
    return %c0_i32 : i32
  }
  func.func @transform_5(%arg0: i32) -> i32 {
    %c0_i32 = arith.constant 0 : i32
    %c0_i32_0 = arith.constant 0 : i32
    return %c0_i32 : i32
  }
  func.func @transform_6(%arg0: i32) -> (i32, i32) {
    %c0_i32 = arith.constant 0 : i32
    %c0_i32_0 = arith.constant 0 : i32
    return %arg0, %c0_i32 : i32, i32
  }
  func.func @transform_7(%arg0: i32) -> (i32, i32) {
    %c0_i32 = arith.constant 0 : i32
    %c0_i32_0 = arith.constant 0 : i32
    return %arg0, %c0_i32 : i32, i32
  }
}

</mosaic_0001>

<bundles_post_ra>
// kernel: tpu_custom_call.1
= control target key start
LH: loop header
LB: loop body
LE: loop exit
PB: predicated region body
PF: predicated region fallthrough
CT: control target
= control target key end

     0   :  { %12 = vsyncpa [#allocation5], 0  ;;  %s807_s0 = inlined_call_operand.hbm [shape: f32[10], index: 0, kind: input, shape index: {}]   ;;  %s808_s1 = inlined_call_operand.vmem [shape: f32[2], index: 1, kind: input, shape index: {}]   ;;  %s809_s2 = inlined_call_operand.vmem [shape: f32[9], index: 2, kind: input, shape index: {}]   ;;  %s810_s3 = inlined_call_operand.vmem [shape: f32[9], index: 3, kind: input, shape index: {}]   ;;  %s811_s4 = inlined_call_operand.vmem [shape: f32[9], index: 4, kind: input, shape index: {}]   ;;  %s812_s5 = inlined_call_operand.vmem [shape: f32[9], index: 5, kind: input, shape index: {}]   ;;  %s813_s6 = inlined_call_operand.hbm [shape: f32[4,512], index: 6, kind: input, shape index: {}]   ;;  %s814_s7 = inlined_call_operand.hbm [shape: f32[4,512], index: 7, kind: output, shape index: {}]  }
   0x1   :  { %13 = vsyncpa [#allocation6], 0 }
   0x2   :  { %14 = vsyncpa [#allocation9], 0 }
   0x3   :  { %15 = vsyncpa [#allocation12], 0 }
   0x4   :  { %16 = vsyncpa [#allocation3], 0  ;;  %s42_s26 = sshll.u32 %s809_s2, 4  ;;  %s43_s26 = int_to_ptr.vmem [resolvable:$true] %s42_s26 }
   0x5   :  { %17 = vsyncpa [#allocation4], 0  ;;  %s62_s29 = sshll.u32 %s811_s4, 4  ;;  %s367_s30 = scalar_lea.vmem %s43_s26, 16  ;;  %s63_s29 = int_to_ptr.vmem [resolvable:$true] %s62_s29 }
   0x6   :  { %p368_p0 = scmp.ne.s32.totalorder %s43_s26, %s367_s30  ;;  %p372_p1 = scmp.lt.s32.totalorder %s43_s26, %s43_s26 }
   0x7   :  { %p373_p2 = scmp.lt.s32.totalorder %s367_s30, %s367_s30 }
   0x9   :  { %p374_p3 = por %p373_p2, %p372_p1 }
   0xb   :  { %p375_p4 = pnand %p374_p3, %p368_p0 }
   0xd   :  { %378 = shalt.err (!%p375_p4)
}
   0xe   :  { %s487_s8 = smov [#allocation8]   ;;  %s379_s9 = scalar_lea.vmem %s63_s29, 16 }
   0xf   :  { %45 = dma.vmem_to_smem %s43_s26, 16, %s487_s8, [#allocation9]  }
  0x10   :  { %p380_p5 = scmp.ne.s32.totalorder %s63_s29, %s379_s9  ;;  %p384_p6 = scmp.lt.s32.totalorder %s63_s29, %s63_s29 }
  0x11   :  { %p385_p7 = scmp.lt.s32.totalorder %s379_s9, %s379_s9 }
  0x13   :  { %p386_p8 = por %p385_p7, %p384_p6 }
  0x15   :  { %p387_p9 = pnand %p386_p8, %p380_p5 }
  0x17   :  { %390 = shalt.err (!%p387_p9)
}
  0x18   :  { %s488_s2 = smov [#allocation11]   ;;  %s32_s11 = sshll.u32 %s808_s1, 4  ;;  %s33_s11 = int_to_ptr.vmem [resolvable:$true] %s32_s11 }
  0x19   :  { %65 = dma.vmem_to_smem %s63_s29, 16, %s488_s2, [#allocation12]  }
  0x1a   :  { %s489_s12 = smov [#allocation2]   ;;  %s399_s15 = scalar_lea.vmem %s33_s11, 16 }
  0x1b   :  { %25 = dma.hbm_to_smem %s807_s0, 16, %s489_s12, [#allocation5]  }
  0x1c   :  { %p400_p10 = scmp.ne.s32.totalorder %s33_s11, %s399_s15  ;;  %p404_p11 = scmp.lt.s32.totalorder %s33_s11, %s33_s11 }
  0x1d   :  { %p405_p12 = scmp.lt.s32.totalorder %s399_s15, %s399_s15 }
  0x1f   :  { %p406_p13 = por %p405_p12, %p404_p11 }
  0x21   :  { %p407_p0 = pnand %p406_p13, %p400_p10 }
  0x23   :  { %410 = shalt.err (!%p407_p0)
}
  0x24   :  { %s490_s16 = smov [#allocation7]   ;;  %s52_s19 = sshll.u32 %s810_s3, 4  ;;  %s53_s19 = int_to_ptr.vmem [resolvable:$true] %s52_s19 }
  0x25   :  { %35 = dma.vmem_to_smem %s33_s11, 16, %s490_s16, [#allocation6]  }
  0x26   :  { %s72_s21 = sshll.u32 %s812_s5, 4  ;;  %s411_s0 = scalar_lea.vmem %s53_s19, 16  ;;  %s73_s21 = int_to_ptr.vmem [resolvable:$true] %s72_s21 }
  0x27   :  { %p412_p1 = scmp.ne.s32.totalorder %s53_s19, %s411_s0  ;;  %p416_p2 = scmp.lt.s32.totalorder %s53_s19, %s53_s19 }
  0x28   :  { %p417_p3 = scmp.lt.s32.totalorder %s411_s0, %s411_s0 }
  0x2a   :  { %p418_p4 = por %p417_p3, %p416_p2 }
  0x2c   :  { %p419_p5 = pnand %p418_p4, %p412_p1 }
  0x2e   :  { %422 = shalt.err (!%p419_p5)
}
  0x2f   :  { %s491_s22 = smov [#allocation10]   ;;  %s423_s23 = scalar_lea.vmem %s73_s21, 16 }
  0x30   :  { %55 = dma.vmem_to_smem %s53_s19, 16, %s491_s22, [#allocation9]  }
  0x31   :  { %p424_p6 = scmp.ne.s32.totalorder %s73_s21, %s423_s23  ;;  %p428_p7 = scmp.lt.s32.totalorder %s73_s21, %s73_s21 }
  0x32   :  { %p429_p8 = scmp.lt.s32.totalorder %s423_s23, %s423_s23 }
  0x34   :  { %p430_p9 = por %p429_p8, %p428_p7 }
  0x36   :  { %p431_p10 = pnand %p430_p9, %p424_p6 }
  0x38   :  { %434 = shalt.err (!%p431_p10)
}
  0x39   :  { %s492_s3 = smov [#allocation13]   ;;  %s493_s5 = smov [#allocation14]  }
  0x3a   :  { %75 = dma.vmem_to_smem %s73_s21, 16, %s492_s3, [#allocation12]  }
  0x3b   :  { %s82_s24 = sshll.u32 %s493_s5, 4  ;;  %s83_s24 = int_to_ptr.vmem [resolvable:$true] %s82_s24 }
  0x3c   :  { %s443_s25 = scalar_lea.vmem %s83_s24, 256  ;;  %p448_p12 = scmp.lt.s32.totalorder %s83_s24, %s83_s24 }
  0x3d   :  { %p444_p11 = scmp.ne.s32.totalorder %s83_s24, %s443_s25  ;;  %p449_p13 = scmp.lt.s32.totalorder %s443_s25, %s443_s25 }
  0x3f   :  { %p450_p0 = por %p449_p13, %p448_p12 }
  0x41   :  { %p451_p1 = pnand %p450_p0, %p444_p11 }
  0x43   :  { %454 = shalt.err (!%p451_p1)
}
  0x44   :  { %85 = dma.hbm_to_vmem [thread:$0]  %s813_s6, 256, %s83_s24, [#allocation3]  }
  0x45   :  { %475 = dma.done.wait [#allocation5], 16  }
  0x46   :  { %476 = vsyncadd [#allocation5], 4294967280 }
  0x47   :  { %477 = dma.done.wait [#allocation6], 16  }
  0x48   :  { %478 = vsyncadd [#allocation6], 4294967280 }
  0x49   :  { %479 = dma.done.wait [#allocation9], 32  }
  0x4a   :  { %480 = vsyncadd [#allocation9], 4294967264 }
  0x4b   :  { %481 = dma.done.wait [#allocation12], 32  }
  0x4c   :  { %482 = vsyncadd [#allocation12], 4294967264 }
  0x4d   :  { %483 = dma.done.wait [#allocation3], 256  }
  0x4e   :  { %484 = vsyncadd [#allocation3], 4294967040 }
  0x4f   :  { %107 = sfence }
  0x50   :  { %s108_s28 = sld [smem:[#allocation2]]  ;;  %v111_v0 = vld [vmem:[#allocation14] sm:$0xff]  ;;  %v112_v1 = vld [vmem:[#allocation14 + $0x8] sm:$0xff] }
  0x51   :  { %s325_s29 = sld [smem:[#allocation7 + $0x1]] }
  0x52   :  { %s326_s30 = sld [smem:[#allocation2 + $0x9]] }
  0x53   :  { %s556_s8 = sld [smem:[#allocation7]] }
  0x54   :  { %s560_s6 = sld [smem:[#allocation8]] }
  0x55   :  { %s564_s9 = sld [smem:[#allocation10]] }
  0x56   :  { %v558_v2 = vstv %s108_s28  ;;  %s566_s2 = sld [smem:[#allocation11]] }
  0x57   :  { %v115_v3 = vmax.f32 %v558_v2, %v111_v0  ;;  %v116_v4 = vmax.f32 %v558_v2, %v112_v1  ;;  %s568_s4 = sld [smem:[#allocation13]]  ;;  %v576_v8 = vstv %s325_s29 }
  0x58   :  { %v117_v5 = vstv %s326_s30  ;;  %s574_s10 = sld [smem:[#allocation8 + $0x1]] }
  0x59   :  { %v570_v6 = vmin.f32 %v117_v5, %v115_v3  ;;  %v572_v7 = vmin.f32 %v117_v5, %v116_v4  ;;  %s578_s11 = sld [smem:[#allocation10 + $0x1]]  ;;  %v131_v17 = vstv %s556_s8 }
  0x5a   :  { %s584_s12 = sld [smem:[#allocation11 + $0x1]]  ;;  %v148_v20 = vstv %s560_s6 }
  0x5b   :  { %v120_v9 = vsub.f32 %v570_v6, %v558_v2  ;;  %v121_v10 = vsub.f32 %v572_v7, %v558_v2  ;;  %s586_s13 = sld [smem:[#allocation13 + $0x1]]  ;;  %v153_v21 = vstv %s564_s9 }
  0x5c   :  { %s590_s14 = sld [smem:[#allocation8 + $0x2]]  ;;  %v158_v22 = vstv %s566_s2 }
  0x5d   :  { %v123_v11 = vmul.f32 %v576_v8, %v120_v9  ;;  %v124_v12 = vmul.f32 %v576_v8, %v121_v10  ;;  %s592_s15 = sld [smem:[#allocation10 + $0x2]]  ;;  %v163_v26 = vstv %s568_s4 }
  0x5e   :  { %s594_s16 = sld [smem:[#allocation11 + $0x2]]  ;;  %v147_v24 = vstv %s574_s10 }
  0x5f   :  { %v125_v13 = vfloor.f32 %v123_v11  ;;  %v126_v14 = vfloor.f32 %v124_v12  ;;  %s596_s17 = sld [smem:[#allocation13 + $0x2]]  ;;  %v152_v25 = vstv %s578_s11 }
  0x60   :  { %s599_s18 = sld [smem:[#allocation8 + $0x3]]  ;;  %v157_v27 = vstv %s584_s12  ;;  %s494_s12 = smov [#allocation15]  }
  0x61   :  { %v127_v15 = vmax.f32 %v125_v13, 0.0  ;;  %v128_v16 = vmax.f32 %v126_v14, 0.0  ;;  %s605_s19 = sld [smem:[#allocation10 + $0x3]]  ;;  %v162_v28 = vstv %s586_s13  ;;  %s312_s13 = sshll.u32 %s494_s12, 4  ;;  %s313_s13 = int_to_ptr.vmem [resolvable:$true] %s312_s13 }
  0x62   :  { %s610_s1 = sld [smem:[#allocation11 + $0x3]]  ;;  %v169_v29 = vstv %s590_s14  ;;  %s455_s14 = scalar_lea.vmem %s313_s13, 256 }
  0x63   :  { %v601_v18 = vmin.f32 %v127_v15, 8.0  ;;  %v603_v19 = vmin.f32 %v128_v16, 8.0  ;;  %s616_s20 = sld [smem:[#allocation13 + $0x3]]  ;;  %v173_v30 = vstv %s592_s15  ;;  %p456_p2 = scmp.ne.s32.totalorder %s313_s13, %s455_s14 }
  0x64   :  { %s622_s21 = sld [smem:[#allocation8 + $0x4]]  ;;  %v177_v35 = vstv %s594_s16  ;;  %p460_p3 = scmp.lt.s32.totalorder %s313_s13, %s313_s13 }
  0x65   :  { %v132_v23 = vmul.f32 %v131_v17, %v601_v18  ;;  %v133_v31 = vmul.f32 %v131_v17, %v603_v19  ;;  %vm144_vm0 = vcmp.ge.f32.partialorder %v601_v18, 1.0  ;;  %vm145_vm1 = vcmp.ge.f32.partialorder %v603_v19, 1.0  ;;  %s628_s0 = sld [smem:[#allocation10 + $0x4]]  ;;  %p461_p4 = scmp.lt.s32.totalorder %s455_s14, %s455_s14 }
  0x66   :  { %v149_v33 = vsel %vm144_vm0, %v147_v24, %v148_v20  ;;  %v150_v34 = vsel %vm145_vm1, %v147_v24, %v148_v20  ;;  %v181_v36 = vstv %s596_s17  ;;  %s632_s22 = sld [smem:[#allocation11 + $0x4]]  ;;  %v154_v37 = vsel %vm144_vm0, %v152_v25, %v153_v21 }
  0x67   :  { %v134_v32 = vadd.f32 %v132_v23, %v558_v2  ;;  %v155_v38 = vsel %vm145_vm1, %v152_v25, %v153_v21  ;;  %v159_v39 = vsel %vm144_vm0, %v157_v27, %v158_v22  ;;  %v160_v40 = vsel %vm145_vm1, %v157_v27, %v158_v22  ;;  %s634_s23 = sld [smem:[#allocation13 + $0x4]]  ;;  %p462_p5 = por %p461_p4, %p460_p3 }
  0x68   :  { %v164_v41 = vsel %vm144_vm0, %v162_v28, %v163_v26  ;;  %v165_v42 = vsel %vm145_vm1, %v162_v28, %v163_v26  ;;  %vm166_vm2 = vcmp.ge.f32.partialorder %v601_v18, 2.0  ;;  %vm167_vm3 = vcmp.ge.f32.partialorder %v603_v19, 2.0  ;;  %s638_s3 = sld [smem:[#allocation8 + $0x5]] }
  0x69   :  { %v641_v43 = vadd.f32 %v133_v31, %v558_v2  ;;  %v136_v44 = vsub.f32 %v570_v6, %v134_v32  ;;  %v170_v45 = vsel %vm166_vm2, %v169_v29, %v149_v33  ;;  %v171_v46 = vsel %vm167_vm3, %v169_v29, %v150_v34  ;;  %s644_s5 = sld [smem:[#allocation10 + $0x5]]  ;;  %p463_p6 = pnand %p462_p5, %p456_p2 }
  0x6a   :  { %v174_v47 = vsel %vm166_vm2, %v173_v30, %v154_v37  ;;  %v178_v48 = vsel %vm166_vm2, %v177_v35, %v159_v39  ;;  %v187_v49 = vstv %s599_s18  ;;  %v191_v50 = vstv %s605_s19  ;;  %s648_s24 = sld [smem:[#allocation11 + $0x5]] }
  0x6b   :  { %v175_v51 = vsel %vm167_vm3, %v173_v30, %v155_v38  ;;  %v179_v52 = vsel %vm167_vm3, %v177_v35, %v160_v40  ;;  %v182_v53 = vsel %vm166_vm2, %v181_v36, %v164_v41  ;;  %v183_v54 = vsel %vm167_vm3, %v181_v36, %v165_v42  ;;  %s650_s25 = sld [smem:[#allocation13 + $0x5]] }
  0x6c   :  { %vm184_vm4 = vcmp.ge.f32.partialorder %v601_v18, 3.0  ;;  %vm185_vm5 = vcmp.ge.f32.partialorder %v603_v19, 3.0  ;;  %v195_v55 = vstv %s610_s1  ;;  %v199_v56 = vstv %s616_s20  ;;  %s656_s26 = sld [smem:[#allocation11 + $0x6]] }
  0x6d   :  { %v188_v57 = vsel %vm184_vm4, %v187_v49, %v170_v45  ;;  %v192_v58 = vsel %vm184_vm4, %v191_v50, %v174_v47  ;;  %v196_v59 = vsel %vm184_vm4, %v195_v55, %v178_v48  ;;  %vm202_vm6 = vcmp.ge.f32.partialorder %v601_v18, 4.0  ;;  %s659_s27 = sld [smem:[#allocation13 + $0x6]] }
  0x6e   :  { %v197_v60 = vsel %vm185_vm5, %v195_v55, %v179_v52  ;;  %v205_v61 = vstv %s622_s21  ;;  %v209_v62 = vstv %s628_s0  ;;  %v213_v63 = vstv %s632_s22  ;;  %s666_s28 = sld [smem:[#allocation10 + $0x6]] }
  0x6f   :  { %v200_v0 = vsel %vm184_vm4, %v199_v56, %v182_v53  ;;  %v201_v1 = vsel %vm185_vm5, %v199_v56, %v183_v54  ;;  %vm203_vm7 = vcmp.ge.f32.partialorder %v603_v19, 4.0  ;;  %v217_v2 = vstv %s634_s23  ;;  %s672_s29 = sld [smem:[#allocation8 + $0x6]] }
  0x70   :  { %v137_v3 = vsub.f32 %v572_v7, %v641_v43  ;;  %v677_v4 = vmul.f32 %v136_v44, %v576_v8  ;;  %v189_v5 = vsel %vm185_vm5, %v187_v49, %v171_v46  ;;  %v193_v6 = vsel %vm185_vm5, %v191_v50, %v175_v51  ;;  %s683_s30 = sld [smem:[#allocation10 + $0x7]] }
  0x71   :  { %v206_v9 = vsel %vm202_vm6, %v205_v61, %v188_v57  ;;  %v210_v7 = vsel %vm202_vm6, %v209_v62, %v192_v58  ;;  %v214_v10 = vsel %vm202_vm6, %v213_v63, %v196_v59  ;;  %v215_v11 = vsel %vm203_vm7, %v213_v63, %v197_v60  ;;  %s693_s8 = sld [smem:[#allocation11 + $0x7]] }
  0x72   :  { %v218_v12 = vsel %vm202_vm6, %v217_v2, %v200_v0  ;;  %v219_v13 = vsel %vm203_vm7, %v217_v2, %v201_v1  ;;  %vm220_vm8 = vcmp.ge.f32.partialorder %v601_v18, 5.0  ;;  %vm221_vm9 = vcmp.ge.f32.partialorder %v603_v19, 5.0  ;;  %s701_s6 = sld [smem:[#allocation13 + $0x7]] }
  0x73   :  { %v223_v14 = vstv %s638_s3  ;;  %v227_v15 = vstv %s644_s5  ;;  %v231_v16 = vstv %s648_s24  ;;  %v235_v17 = vstv %s650_s25  ;;  %s707_s9 = sld [smem:[#allocation11 + $0x8]] }
  0x74   :  { %v232_v20 = vsel %vm220_vm8, %v231_v16, %v214_v10  ;;  %v233_v21 = vsel %vm221_vm9, %v231_v16, %v215_v11  ;;  %vm238_vm10 = vcmp.ge.f32.partialorder %v601_v18, 6.0  ;;  %vm239_vm11 = vcmp.ge.f32.partialorder %v603_v19, 6.0  ;;  %s715_s2 = sld [smem:[#allocation13 + $0x8]] }
  0x75   :  { %v236_v22 = vsel %vm220_vm8, %v235_v17, %v218_v12  ;;  %v237_v23 = vsel %vm221_vm9, %v235_v17, %v219_v13  ;;  %v249_v24 = vstv %s656_s26  ;;  %v253_v25 = vstv %s659_s27  ;;  %s723_s4 = sld [smem:[#allocation8 + $0x7]] }
  0x76   :  { %v139_v26 = vmul.f32 %v137_v3, %v576_v8  ;;  %v211_v27 = vsel %vm203_vm7, %v209_v62, %v193_v6  ;;  %v228_v28 = vsel %vm220_vm8, %v227_v15, %v210_v7  ;;  %v245_v29 = vstv %s666_s28  ;;  %s739_s10 = sld [smem:[#allocation10 + $0x8]] }
  0x77   :  { %v207_v30 = vsel %vm203_vm7, %v205_v61, %v189_v5  ;;  %v224_v31 = vsel %vm220_vm8, %v223_v14, %v206_v9  ;;  %v250_v32 = vsel %vm238_vm10, %v249_v24, %v232_v20  ;;  %v251_v8 = vsel %vm239_vm11, %v249_v24, %v233_v21  ;;  %s355_s11 = sld [smem:[#allocation8 + $0x8]] }
  0x78   :  { %v254_v33 = vsel %vm238_vm10, %v253_v25, %v236_v22  ;;  %v255_v34 = vsel %vm239_vm11, %v253_v25, %v237_v23  ;;  %vm256_vm12 = vcmp.ge.f32.partialorder %v601_v18, 7.0  ;;  %vm257_vm13 = vcmp.ge.f32.partialorder %v603_v19, 7.0 }
  0x79   :  { %v229_v35 = vsel %vm221_vm9, %v227_v15, %v211_v27  ;;  %v241_v36 = vstv %s672_s29  ;;  %v246_v37 = vsel %vm238_vm10, %v245_v29, %v228_v28  ;;  %v263_v38 = vstv %s683_s30 }
  0x7a   :  { %v267_v39 = vstv %s693_s8  ;;  %v271_v40 = vstv %s701_s6  ;;  %vm274_vm14 = vcmp.ge.f32.partialorder %v601_v18, 8.0  ;;  %vm275_vm15 = vcmp.ge.f32.partialorder %v603_v19, 8.0 }
  0x7b   :  { %v268_v41 = vsel %vm256_vm12, %v267_v39, %v250_v32  ;;  %v269_v42 = vsel %vm257_vm13, %v267_v39, %v251_v8  ;;  %v272_v43 = vsel %vm256_vm12, %v271_v40, %v254_v33  ;;  %v273_v44 = vsel %vm257_vm13, %v271_v40, %v255_v34 }
  0x7c   :  { %v247_v45 = vsel %vm239_vm11, %v245_v29, %v229_v35  ;;  %v285_v46 = vstv %s707_s9  ;;  %v289_v47 = vstv %s715_s2  ;;  %v225_v48 = vsel %vm221_vm9, %v223_v14, %v207_v30 }
  0x7d   :  { %v242_v49 = vsel %vm238_vm10, %v241_v36, %v224_v31  ;;  %v259_v50 = vstv %s723_s4  ;;  %v264_v51 = vsel %vm256_vm12, %v263_v38, %v246_v37  ;;  %v286_v52 = vsel %vm274_vm14, %v285_v46, %v268_v41 }
  0x7e   :  { %v287_v53 = vsel %vm275_vm15, %v285_v46, %v269_v42  ;;  %v290_v54 = vsel %vm274_vm14, %v289_v47, %v272_v43  ;;  %v291_v55 = vsel %vm275_vm15, %v289_v47, %v273_v44  ;;  %v265_v56 = vsel %vm257_vm13, %v263_v38, %v247_v45 }
  0x7f   :  { %v281_v57 = vstv %s739_s10  ;;  %v292_v58 = vmul.f32 %v290_v54, %v677_v4  ;;  %v293_v59 = vmul.f32 %v291_v55, %v139_v26  ;;  %v243_v60 = vsel %vm239_vm11, %v241_v36, %v225_v48 }
  0x80   :  { %v260_v63 = vsel %vm256_vm12, %v259_v50, %v242_v49  ;;  %v282_v0 = vsel %vm274_vm14, %v281_v57, %v264_v51  ;;  %v283_v1 = vsel %vm275_vm15, %v281_v57, %v265_v56  ;;  %v261_v2 = vsel %vm257_vm13, %v259_v50, %v243_v60 }
  0x81   :  { %v294_v61 = vadd.f32 %v292_v58, %v286_v52  ;;  %v295_v62 = vadd.f32 %v293_v59, %v287_v53  ;;  %v277_v3 = vstv %s355_s11 }
  0x82   :  { %v278_v10 = vsel %vm274_vm14, %v277_v3, %v260_v63  ;;  %v279_v11 = vsel %vm275_vm15, %v277_v3, %v261_v2 }
  0x83   :  { %v296_v5 = vmul.f32 %v294_v61, %v677_v4  ;;  %v297_v6 = vmul.f32 %v295_v62, %v139_v26 }
  0x85   :  { %v298_v9 = vadd.f32 %v296_v5, %v282_v0  ;;  %v299_v7 = vadd.f32 %v297_v6, %v283_v1 }
  0x87   :  { %v300_v12 = vmul.f32 %v298_v9, %v677_v4  ;;  %v301_v13 = vmul.f32 %v299_v7, %v139_v26 }
  0x89   :  { %v302_v14 = vadd.f32 %v300_v12, %v278_v10  ;;  %v303_v15 = vadd.f32 %v301_v13, %v279_v11 }
  0x8b   :  { %304 = vst [vmem:[#allocation15] sm:$0xff] %v302_v14  ;;  %305 = vst [vmem:[#allocation15 + $0x8] sm:$0xff] %v303_v15 }
  0x8c   :  { %466 = shalt.err (!%p463_p6)
}
  0x8d   :  { %315 = dma.vmem_to_hbm [thread:$0]  %s313_s13, 256, %s814_s7, [#allocation4]  }
  0x8e   :  { %485 = dma.done.wait [#allocation4], 256  }
  0x8f   :  { %486 = vsyncadd [#allocation4], 4294967040 }
  0x90   :  { %319 = vsyncpa [#allocation3], 1 }
  0x91   :  { %320 = vsyncpa [#allocation4], 1 }
  0x92   :  { %321 = vsyncpa [#allocation5], 1 }
  0x93   :  { %322 = vsyncpa [#allocation6], 1 }
  0x94   :  { %323 = vsyncpa [#allocation9], 1 }
  0x95   :  { %324 = vsyncpa [#allocation12], 1 }

</bundles_post_ra>
